<compile_context>
chip_gen: v7x
topology: tpu7x:2x2x1
jax: 0.10.0
libtpu: 0.0.40
codegen_flags: <defaults>
</compile_context>

<pallas_src>
import functools
import math

import jax
import jax.numpy as jnp
from jax.experimental import pallas as pl
from jax.experimental.pallas import tpu as pltpu

_NEG_SLOPE = 0.01  # PyTorch F.leaky_relu default


def _leaky_relu(x):
    return jnp.where(x > 0, x, _NEG_SLOPE * x)


def _keep_mask(shape, seed_i32, salt, p):
    """Counter-based dropout keep-mask (lowbias32 hash). Pure jnp: works on TPU and in
    interpret mode. keep probability = 1 - p, via an integer threshold compare."""
    rows, cols = shape
    row_id = jax.lax.broadcasted_iota(jnp.int32, shape, 0)
    col_id = jax.lax.broadcasted_iota(jnp.int32, shape, 1)
    idx = (row_id * cols + col_id).astype(jnp.uint32)
    base = seed_i32.astype(jnp.uint32) * jnp.uint32(0x9E3779B9) + jnp.uint32(salt)
    h = idx + base
    h = h ^ (h >> jnp.uint32(16))
    h = h * jnp.uint32(0x7FEB352D)
    h = h ^ (h >> jnp.uint32(15))
    h = h * jnp.uint32(0x846CA68B)
    h = h ^ (h >> jnp.uint32(16))
    r = (h >> jnp.uint32(1)).astype(jnp.int32)              # uniform in [0, 2**31)
    thresh = jnp.int32(min(int(round(p * 2.0 ** 31)), 2 ** 31 - 1))
    return r >= thresh                                      # True -> keep


def _dropout(x, p, seed_i32, salt):
    """F.dropout(x, p, training=True): zero with prob p, scale survivors by 1/(1-p)."""
    if p <= 0.0:
        return x
    if p >= 1.0:
        return jnp.zeros_like(x)
    keep = _keep_mask(x.shape, seed_i32, salt, p)
    scale = jnp.float32(1.0 / (1.0 - p))
    return jnp.where(keep, x * scale, jnp.zeros_like(x))


def vanilla_nn_kernel(seed_ref, x_ref, slab_ref, out_ref, *, dims, offs, dropout_p):
    """Single-invocation kernel.  x_ref: (1, n_feat) = column 0 of the (n_feat, N) input,
    slab_ref: packed params  [W1^T | b1 | W2^T | b2 | W3[0,:] | b3[0]]  in one VMEM tile."""
    n_feat, n_h1, n_h2 = dims
    o_w1, o_b1, o_w2, o_b2, o_w3, o_b3 = offs
    seed = seed_ref[0]

    x0 = x_ref[...]                                              # (1, n_feat)

    w1t = slab_ref[o_w1:o_w1 + n_feat, 0:n_h1]                   # (n_feat, n_h1) == W1^T
    b1 = slab_ref[o_b1:o_b1 + 1, 0:n_h1]                         # (1, n_h1)
    h1 = jnp.dot(x0, w1t, preferred_element_type=jnp.float32) + b1
    h1 = _dropout(_leaky_relu(h1), dropout_p, seed, salt=0x11111111)

    w2t = slab_ref[o_w2:o_w2 + n_h1, 0:n_h2]                     # (n_h1, n_h2) == W2^T
    b2 = slab_ref[o_b2:o_b2 + 1, 0:n_h2]                         # (1, n_h2)
    h2 = jnp.dot(h1, w2t, preferred_element_type=jnp.float32) + b2
    h2 = _dropout(_leaky_relu(h2), dropout_p, seed, salt=0x22222222)

    w3r = slab_ref[o_w3:o_w3 + 1, 0:n_h2]                        # (1, n_h2) == W3[0, :]
    b3 = slab_ref[o_b3:o_b3 + 1, 0:1]                            # (1, 1)    == b3[0]
    y = jnp.sum(h2 * w3r, axis=1, keepdims=True) + b3            # (1, 1)
    out_ref[...] = _leaky_relu(y)


def _rup(a, m):
    return ((a + m - 1) // m) * m


def pack_params(params):
    """Pack (W1,b1,W2,b2,W3,b3) (PyTorch (out,in) layout) into one (8,128)-aligned f32 slab.
    Weights are stored transposed to (in, out); only row 0 of W3 / b3 is kept."""
    w1, b1, w2, b2, w3, b3 = [jnp.asarray(p, jnp.float32) for p in params]
    n_h1, n_feat = w1.shape
    n_h2, _ = w2.shape

    o_w1 = 0
    o_b1 = _rup(o_w1 + n_feat, 8)
    o_w2 = _rup(o_b1 + 1, 8)
    o_b2 = _rup(o_w2 + n_h1, 8)
    o_w3 = _rup(o_b2 + 1, 8)
    o_b3 = _rup(o_w3 + 1, 8)
    rows = _rup(o_b3 + 1, 8)
    lanes = _rup(max(n_h1, n_h2), 128)

    slab = jnp.zeros((rows, lanes), jnp.float32)
    slab = slab.at[o_w1:o_w1 + n_feat, 0:n_h1].set(w1.T)
    slab = slab.at[o_b1, 0:n_h1].set(b1)
    slab = slab.at[o_w2:o_w2 + n_h1, 0:n_h2].set(w2.T)
    slab = slab.at[o_b2, 0:n_h2].set(b2)
    slab = slab.at[o_w3, 0:n_h2].set(w3[0, :])
    slab = slab.at[o_b3, 0].set(b3[0])

    dims = (n_feat, n_h1, n_h2)
    offs = (o_w1, o_b1, o_w2, o_b2, o_w3, o_b3)
    return slab, dims, offs


def make_vanilla_nn(params, dropout_p):
    """Returns a jitted forward(x, seed) -> scalar, with x shaped (n_feat, N) like the
    PyTorch module's input.  Params are packed once at build time (no per-call glue)."""
    slab, dims, offs = pack_params(params)
    n_feat = dims[0]

    kernel = functools.partial(vanilla_nn_kernel, dims=dims, offs=offs,
                               dropout_p=float(dropout_p))
    vmem = pl.BlockSpec(memory_space=pltpu.MemorySpace.VMEM)
    smem = pl.BlockSpec(memory_space=pltpu.MemorySpace.SMEM)
    call = pl.pallas_call(
        kernel,
        out_shape=jax.ShapeDtypeStruct((1, 1), jnp.float32),
        in_specs=[smem, vmem, vmem],
        out_specs=vmem,
    )

    @jax.jit
    def forward(x, seed):
        # Only column 0 of x (row 0 after the module's transpose) reaches out[0][0].
        x0 = jnp.transpose(x[:, 0:1]).astype(jnp.float32)        # (1, n_feat)
        seed_arr = jnp.reshape(jnp.asarray(seed, jnp.int32), (1,))
        return call(seed_arr, x0, slab)[0, 0]

    return forward


def init_params(key, n_feat, n_hid_1, n_hid_2, out_dim):
    """xavier_uniform weights, standard-normal biases (matches the module's init intent)."""
    def xavier(k, fan_out, fan_in):
        bound = math.sqrt(6.0 / (fan_in + fan_out))
        return jax.random.uniform(k, (fan_out, fan_in), jnp.float32, -bound, bound)

    ks = jax.random.split(key, 6)
    w1 = xavier(ks[0], n_hid_1, n_feat)
    b1 = jax.random.normal(ks[1], (n_hid_1,), jnp.float32)
    w2 = xavier(ks[2], n_hid_2, n_hid_1)
    b2 = jax.random.normal(ks[3], (n_hid_2,), jnp.float32)
    w3 = xavier(ks[4], out_dim, n_hid_2)
    b3 = jax.random.normal(ks[5], (out_dim,), jnp.float32)
    return (w1, b1, w2, b2, w3, b3)


if __name__ == "__main__":
    # Small shapes consistent with the module: x is (n_feat, N) because forward transposes it.
    n_feat, n_hid_1, n_hid_2, out_dim = 32, 64, 32, 4
    N = 8
    dropout_p = 0.25

    key = jax.random.PRNGKey(0)
    k_x, k_p = jax.random.split(key)
    x = jax.random.normal(k_x, (n_feat, N), jnp.float32)
    params = init_params(k_p, n_feat, n_hid_1, n_hid_2, out_dim)

    # Correctness check against a pure-JAX reference with dropout disabled (deterministic).
    fwd_eval = make_vanilla_nn(params, 0.0)
    got = fwd_eval(x, 0)
    w1, b1, w2, b2, w3, b3 = params
    lr = lambda v: jnp.where(v > 0, v, _NEG_SLOPE * v)
    h1_ref = lr(x.T @ w1.T + b1)
    h2_ref = lr(h1_ref @ w2.T + b2)
    ref = lr((h2_ref @ w3.T + b3)[0, 0])
    assert jnp.allclose(got, ref, rtol=1e-5, atol=1e-5), (got, ref)

    # Training-mode forward (dropout applied), as in the PyTorch module.
    forward = make_vanilla_nn(params, dropout_p)
    out = forward(x, 42)
    jax.block_until_ready(out)
    assert out.shape == () and out.dtype == jnp.float32
    print("KERNEL_OK")
</pallas_src>

<mosaic_0001>
module attributes {stable_mosaic.version = 11 : i64} {
  func.func @vanilla_nn_kernel(%arg0: memref<1xi32, #tpu.memory_space<smem>>, %arg1: memref<1x32xf32, #tpu.memory_space<vmem>>, %arg2: memref<128x128xf32, #tpu.memory_space<vmem>>, %arg3: memref<1x1xf32, #tpu.memory_space<vmem>>) attributes {dimension_semantics = [], scalar_prefetch = 0 : i64, scratch_operands = 0 : i64, tpu.core_type = #tpu.core_type<tc>} {
    %c0 = arith.constant 0 : index
    %c0_0 = arith.constant 0 : index
    %0 = vector.load %arg1[%c0, %c0_0] : memref<1x32xf32, #tpu.memory_space<vmem>>, vector<1x32xf32>
    %c0_1 = arith.constant 0 : index
    %c0_2 = arith.constant 0 : index
    %1 = vector.load %arg2[%c0_1, %c0_2] : memref<128x128xf32, #tpu.memory_space<vmem>>, vector<32x64xf32>
    %c32 = arith.constant 32 : index
    %c0_3 = arith.constant 0 : index
    %2 = vector.load %arg2[%c32, %c0_3] : memref<128x128xf32, #tpu.memory_space<vmem>>, vector<1x64xf32>
    %cst = arith.constant dense<0.000000e+00> : vector<1x64xf32>
    %3 = tpu.matmul %0, %1, %cst {dimension_numbers = #tpu.dot_dimension_numbers<[1], [0], [0], [1], [0, 0, 1, 1], [], []>} : vector<1x32xf32>, vector<32x64xf32>, vector<1x64xf32> -> vector<1x64xf32>
    %4 = arith.addf %3, %2 : vector<1x64xf32>
    %cst_4 = arith.constant 0.000000e+00 : f32
    %5 = vector.broadcast %cst_4 : f32 to vector<1x64xf32>
    %6 = arith.cmpf ogt, %4, %5 : vector<1x64xf32>
    %cst_5 = arith.constant 0.00999999977 : f32
    %7 = vector.broadcast %cst_5 : f32 to vector<1x64xf32>
    %8 = arith.mulf %7, %4 : vector<1x64xf32>
    %9 = arith.select %6, %4, %8 : vector<1x64xi1>, vector<1x64xf32>
    %c40 = arith.constant 40 : index
    %c0_6 = arith.constant 0 : index
    %10 = vector.load %arg2[%c40, %c0_6] : memref<128x128xf32, #tpu.memory_space<vmem>>, vector<64x32xf32>
    %c104 = arith.constant 104 : index
    %c0_7 = arith.constant 0 : index
    %11 = vector.load %arg2[%c104, %c0_7] : memref<128x128xf32, #tpu.memory_space<vmem>>, vector<1x32xf32>
    %cst_8 = arith.constant dense<0.000000e+00> : vector<1x32xf32>
    %12 = tpu.matmul %9, %10, %cst_8 {dimension_numbers = #tpu.dot_dimension_numbers<[1], [0], [0], [1], [0, 0, 1, 1], [], []>} : vector<1x64xf32>, vector<64x32xf32>, vector<1x32xf32> -> vector<1x32xf32>
    %13 = arith.addf %12, %11 : vector<1x32xf32>
    %cst_9 = arith.constant 0.000000e+00 : f32
    %14 = vector.broadcast %cst_9 : f32 to vector<1x32xf32>
    %15 = arith.cmpf ogt, %13, %14 : vector<1x32xf32>
    %cst_10 = arith.constant 0.00999999977 : f32
    %16 = vector.broadcast %cst_10 : f32 to vector<1x32xf32>
    %17 = arith.mulf %16, %13 : vector<1x32xf32>
    %18 = arith.select %15, %13, %17 : vector<1x32xi1>, vector<1x32xf32>
    %c112 = arith.constant 112 : index
    %c0_11 = arith.constant 0 : index
    %19 = vector.load %arg2[%c112, %c0_11] : memref<128x128xf32, #tpu.memory_space<vmem>>, vector<1x32xf32>
    %c120 = arith.constant 120 : index
    %c0_12 = arith.constant 0 : index
    %20 = vector.load %arg2[%c120, %c0_12] : memref<128x128xf32, #tpu.memory_space<vmem>>, vector<1x1xf32>
    %21 = arith.mulf %18, %19 : vector<1x32xf32>
    %cst_13 = arith.constant dense<0.000000e+00> : vector<1xf32>
    %22 = vector.multi_reduction <add>, %21, %cst_13 [1] : vector<1x32xf32> to vector<1xf32>
    %23 = vector.shape_cast %22 : vector<1xf32> to vector<1x1xf32>
    %24 = arith.addf %23, %20 : vector<1x1xf32>
    %cst_14 = arith.constant 0.000000e+00 : f32
    %25 = vector.broadcast %cst_14 : f32 to vector<1x1xf32>
    %26 = arith.cmpf ogt, %24, %25 : vector<1x1xf32>
    %cst_15 = arith.constant 0.00999999977 : f32
    %27 = vector.broadcast %cst_15 : f32 to vector<1x1xf32>
    %28 = arith.mulf %27, %24 : vector<1x1xf32>
    %29 = arith.select %26, %24, %28 : vector<1x1xi1>, vector<1x1xf32>
    %c0_16 = arith.constant 0 : index
    %c0_17 = arith.constant 0 : index
    %30 = vector.load %arg3[%c0_16, %c0_17] : memref<1x1xf32, #tpu.memory_space<vmem>>, vector<1x1xf32>
    tpu.vector_store %arg3[%c0_16, %c0_17], %29 {strides = array<i32>} : memref<1x1xf32, #tpu.memory_space<vmem>>, vector<1x1xf32>,
    return
  }
}

</mosaic_0001>

<bundles_post_ra>
// kernel: forward.1
= control target key start
LH: loop header
LB: loop body
LE: loop exit
PB: predicated region body
PF: predicated region fallthrough
CT: control target
= control target key end

     0   :  { %9 = vsyncpa [#allocation4], 0  ;;  %s400_s0 = inlined_call_operand.<no memory space> [shape: s32[1], index: 0, kind: input, shape index: {}]   ;;  %s401_s1 = inlined_call_operand.vmem [shape: f32[1,32], index: 1, kind: input, shape index: {}]   ;;  %s402_s2 = inlined_call_operand.hbm [shape: f32[128,128], index: 2, kind: input, shape index: {}]   ;;  %s403_s3 = inlined_call_operand.hbm [shape: f32[1,1], index: 3, kind: output, shape index: {}]  }
   0x1   :  { %10 = vsyncpa [#allocation5], 0  ;;  %s346_s12 = smov [#allocation3]   ;;  %s298_s16 = scalar_lea.hbm %s402_s2, 2048 }
   0x2   :  { %s20_s13 = sshll.u32 %s346_s12, 4  ;;  %p299_p0 = scmp.ne.s32.totalorder %s402_s2, %s298_s16  ;;  %s21_s13 = int_to_ptr.vmem [resolvable:$true] %s20_s13 }
   0x3   :  { %p302_p1 = scmp.lt.u32.totalorder %s298_s16, %s402_s2 }
   0x5   :  { %p304_p2 = pnand %p302_p1, %p299_p0 }
   0x7   :  { %307 = shalt.err (!%p304_p2)
}
   0x8   :  { %s308_s20 = scalar_lea.vmem %s21_s13, 2048  ;;  %p313_p4 = scmp.lt.s32.totalorder %s21_s13, %s21_s13 }
   0x9   :  { %p309_p3 = scmp.ne.s32.totalorder %s21_s13, %s308_s20  ;;  %p314_p5 = scmp.lt.s32.totalorder %s308_s20, %s308_s20 }
   0xb   :  { %p315_p6 = por %p314_p5, %p313_p4 }
   0xd   :  { %p316_p7 = pnand %p315_p6, %p309_p3 }
   0xf   :  { %319 = shalt.err (!%p316_p7)
}
  0x10   :  { %s347_s21 = smov 128   ;;  %s348_s22 = smov 8  }
  0x11   :  { %26 = dma.hbm_to_vmem [thread:$0]  %s402_s2, 2048, %s21_s13, [#allocation4], %s347_s21, %s347_s21, %s348_s22  }
  0x12   :  { %342 = dma.done.wait [#allocation4], 2048  }
  0x13   :  { %343 = vsyncadd [#allocation4], 4294965248  ;;  %v349_v0 = vmov 0.0|0.0   ;;  %vm350_vm0 = vmmov 0   ;;  %v351_v1 = vmov 0.0   ;;  %v31_v2 = vld [vmem:[#allocation3] sm:$0xff] }
  0x14   :  { %273 = vmatprep.subr.bf16.mxu0 %v349_v0  ;;  %251 = vmatprep.mubr.msk.f32.mxu0 %vm350_vm0, %v351_v1  ;;  %v32_v3 = vld [vmem:[#allocation3 + $0x8] sm:$0xff]  ;;  %v33_v4 = vld [vmem:[#allocation3 + $0x10] sm:$0xff]  ;;  %v34_v6 = vld [vmem:[#allocation3 + $0x18] sm:$0xff]  ;;  %vm36_vm1 = vcmask 261120   ;;  %vm122_vm3 = vcmask 523264   ;;  %vm202_vm5 = vcmask 253952  }
  0x15   :  { %279 = vmatprep.subr.bf16.mxu1 %v349_v0  ;;  %270 = vmatprep.mubr.msk.f32.mxu1 %vm350_vm0, %v351_v1  ;;  %v274_v5 = vpack.c.bf16 %v32_v3, %v31_v2  ;;  %v113_v7 = vld [vmem:[#allocation3 + $0x28] sm:$0xff]  ;;  %v114_v8 = vld [vmem:[#allocation3 + $0x30] sm:$0xff]  ;;  %v115_v9 = vld [vmem:[#allocation3 + $0x38] sm:$0xff]  ;;  %v277_v11 = vpack.c.bf16 %v34_v6, %v33_v4  ;;  %vm210_vm7 = vcmask 0  }
  0x16   :  { %v116_v10 = vld [vmem:[#allocation3 + $0x40] sm:$0xff]  ;;  %v280_v12 = vpack.c.bf16 %v114_v8, %v113_v7  ;;  %v117_v14 = vld [vmem:[#allocation3 + $0x48] sm:$0xff]  ;;  %v118_v15 = vld [vmem:[#allocation3 + $0x50] sm:$0xff] }
  0x17   :  { %275 = vmatpush3.bf16.msra.mxu0 %v274_v5  ;;  %v283_v13 = vpack.c.bf16 %v116_v10, %v115_v9  ;;  %v30_v16 = vld [vmem:[%s401_s1] sm:$0x1]  ;;  %v286_v17 = vpack.c.bf16 %v118_v15, %v117_v14  ;;  %v119_v18 = vld [vmem:[#allocation3 + $0x58] sm:$0xff]  ;;  %v121_v27 = vld [vmem:[#allocation3 + $0x68] sm:$0x1]  ;;  %s352_s1 = smov [#allocation6]  }
  0x18   :  { %276 = vmatprep.subr.bf16.mxu0 %v349_v0  ;;  %281 = vmatpush3.bf16.msra.mxu1 %v280_v12  ;;  %v120_v19 = vld [vmem:[#allocation3 + $0x60] sm:$0xff]  ;;  %v199_v32 = vld [vmem:[#allocation3 + $0x70] sm:$0x1]  ;;  %v200_v36 = vld [vmem:[#allocation3 + $0x78] sm:$0x1]  ;;  %s218_s26 = sshll.u32 %s352_s1, 4  ;;  %s219_s26 = int_to_ptr.vmem [resolvable:$true] %s218_s26 }
  0x19   :  { %282 = vmatprep.subr.bf16.mxu1 %v349_v0  ;;  %v289_v20 = vpack.c.bf16 %v120_v19, %v119_v18  ;;  %v35_v21 = vld [vmem:[#allocation3 + $0x20] sm:$0x1]  ;;  %s320_s27 = scalar_lea.vmem %s219_s26, 16  ;;  %s324_s28 = scalar_lea.vmem %s219_s26, 32 }
  0x1a   :  { %p321_p8 = scmp.ne.s32.totalorder %s219_s26, %s320_s27  ;;  %p325_p9 = scmp.lt.s32.totalorder %s219_s26, %s219_s26 }
  0x1b   :  { %278 = vmatpush3.bf16.msra.mxu0 %v277_v11  ;;  %p326_p10 = scmp.lt.s32.totalorder %s324_s28, %s320_s27 }
  0x1c   :  { %284 = vmatpush3.bf16.msra.mxu1 %v283_v13 }
  0x1d   :  { %285 = vmatprep.subr.bf16.mxu1 %v349_v0  ;;  %p327_p11 = por %p326_p10, %p325_p9 }
  0x1e   :  { %252 = vmatmul.mubr.msk.f32.vlgmr.msra.gmra.mrb[0].mxu0 %vm36_vm1, %v30_v16 }
  0x1f   :  { %p328_p12 = pnand %p327_p11, %p321_p8 }
  0x20   :  { %287 = vmatpush3.bf16.msra.mxu1 %v286_v17 }
  0x21   :  { %288 = vmatprep.subr.bf16.mxu1 %v349_v0 }
  0x24   :  { %290 = vmatpush3.bf16.msra.mxu1 %v289_v20 }
  0xf1   :  { %v106_v22 = vpop.f32.mrb[0].mxu0 }
  0xf2   :  { %v107_v23 = vadd.f32 %v106_v22, %v35_v21  ;;  %v253_v24 = vpop.f32.mrb[1].mxu0 }
  0xf4   :  { %vm110_vm2 = vcmp.gt.f32.partialorder %v107_v23, 0.0  ;;  %v111_v25 = vmul.f32 0.01, %v107_v23 }
  0xf6   :  { %v112_v26 = vsel %vm110_vm2, %v107_v23, %v111_v25 }
  0xf7   :  { %271 = vmatmul.mubr.msk.f32.vlgmr.msra.gmra.mrb[0].mxu1 %vm122_vm3, %v112_v26 }
 0x1ca   :  { %v192_v28 = vpop.f32.mrb[0].mxu1 }
 0x1cb   :  { %v193_v29 = vadd.f32 %v192_v28, %v121_v27  ;;  %v272_v30 = vpop.f32.mrb[1].mxu1 }
 0x1cd   :  { %v197_v31 = vmul.f32 0.01, %v193_v29  ;;  %vm196_vm4 = vcmp.gt.f32.partialorder %v193_v29, 0.0 }
 0x1cf   :  { %v198_v33 = vsel %vm196_vm4, %v193_v29, %v197_v31 }
 0x1d0   :  { %v201_v34 = vmul.f32 %v199_v32, %v198_v33 }
 0x1d2   :  { %v203_v35 = vsel %vm202_vm5, %v201_v34, 0.0 }
 0x1d3   :  { %204 = vadd.xlane.f32.xlu0 %v203_v35 }
 0x260   :  { %v205_v37 = vpop.xlane.xlu0 %204 }
 0x261   :  { %v206_v38 = vadd.f32 %v205_v37, %v200_v36 }
 0x263   :  { %vm207_vm6 = vcmp.gt.f32.partialorder %v206_v38, 0.0  ;;  %v208_v39 = vmul.f32 0.01, %v206_v38 }
 0x265   :  { %v209_v40 = vsel %vm207_vm6, %v206_v38, %v208_v39 }
 0x266   :  { %211 = vst.msk [vmem:[#allocation6] sm:$0x1] %vm210_vm7, %v209_v40 }
 0x267   :  { %331 = shalt.err (!%p328_p12)
}
 0x268   :  { %s332_s4 = scalar_lea.hbm %s403_s3, 16 }
 0x269   :  { %p333_p13 = scmp.ne.s32.totalorder %s403_s3, %s332_s4  ;;  %p336_p0 = scmp.lt.u32.totalorder %s332_s4, %s403_s3 }
 0x26b   :  { %p338_p1 = pnand %p336_p0, %p333_p13 }
 0x26d   :  { %341 = shalt.err (!%p338_p1)
}
 0x26e   :  { %221 = dma.vmem_to_hbm [thread:$0]  %s219_s26, 16, %s403_s3, [#allocation5]  }
 0x26f   :  { %344 = dma.done.wait [#allocation5], 16  }
 0x270   :  { %345 = vsyncadd [#allocation5], 4294967280 }
 0x271   :  { %225 = vsyncpa [#allocation4], 1 }
 0x272   :  { %226 = vsyncpa [#allocation5], 1 }

</bundles_post_ra>
